<compile_context>
chip_gen: v6e
topology: v6e:2x2x1
jax: 0.10.0
libtpu: 0.0.40
codegen_flags: <defaults>
</compile_context>

<pallas_src>
import functools

import jax
import jax.numpy as jnp
from jax.experimental import pallas as pl
from jax.experimental.pallas import tpu as pltpu

_NEG_BIG = -1e30  # finite "-inf" used to mask padded sequence positions


def _bahdanau_kernel(vals_ref, s2_ref, w1_ref, v_ref, bv_ref,
                     ctx_ref, attn_ref, *, cb, s_pad, s_real, n_steps):
    """One grid step: `cb` batch items flattened into cb*s_pad matmul rows."""
    m_rows = cb * s_pad

    vals = vals_ref[...]                                     # (M, F) input dtype
    vals_mx = vals.astype(jnp.bfloat16)                      # MXU operand dtype

    # W1(values): one (M, F) @ (F, H) bf16 MXU matmul, f32 accumulation.
    s1 = jnp.dot(vals_mx, w1_ref[...], preferred_element_type=jnp.float32)

    # Hoisted query projection (already contains b1 + b2), resident in VMEM
    # for the whole grid; slice this chunk's rows, broadcast over seq axis.
    if n_steps == 1:
        s2 = s2_ref[...]                                     # (cb, H) f32
    else:
        off = pl.multiple_of(pl.program_id(0) * cb, 8)       # cb % 8 == 0 here
        s2 = s2_ref[pl.ds(off, cb), :]
    t = jnp.tanh(s1.reshape(cb, s_pad, -1) + s2[:, None, :])  # f32 (cb,S_pad,H)

    # V(tanh(.)): second bf16 MXU matmul over the full chunk.
    score = jnp.dot(t.reshape(m_rows, -1).astype(jnp.bfloat16), v_ref[...],
                    preferred_element_type=jnp.float32) + bv_ref[...]   # (M, T)

    # ONE batched transpose to (cb, T, S_pad): softmax then reduces over the
    # minor (lane) seq axis and the attention writeback is a single bulk
    # store with no per-item unrolled transposes.
    score = jnp.swapaxes(score.reshape(cb, s_pad, -1), 1, 2)  # (cb, T, S_pad)

    if s_pad != s_real:                                       # mask seq padding
        seq_idx = jax.lax.broadcasted_iota(jnp.int32, score.shape, 2)
        score = jnp.where(seq_idx < s_real, score, _NEG_BIG)

    # Softmax over the sequence axis (PyTorch Softmax(dim=1)), exact norm.
    m = jnp.max(score, axis=-1, keepdims=True)
    e = jnp.exp(score - m)
    attn = e / jnp.sum(e, axis=-1, keepdims=True)             # (cb, T, S_pad) f32

    # context[b] = attn[b] @ values[b]: contract the seq axis directly.
    ctx = jax.lax.dot_general(
        attn.astype(jnp.bfloat16), vals_mx.reshape(cb, s_pad, -1),
        dimension_numbers=(((2,), (1,)), ((0,), (0,))),
        preferred_element_type=jnp.float32)                   # (cb, T, F)

    ctx_ref[...] = ctx.astype(ctx_ref.dtype)
    attn_ref[...] = attn.astype(attn_ref.dtype)               # bulk store


def bahdanau_attention(hidden_states, values, params, *, rows_per_step=4096):
    """hidden_states: (B, F); values: (B, S, F) -> (context (B,T,F), attn (B,S,T))."""
    B, S, F = values.shape
    w1, b1, w2, b2, v, bv = params
    H = w1.shape[1]
    T = v.shape[1]
    out_dtype = values.dtype
    in_itemsize = jnp.dtype(values.dtype).itemsize
    out_itemsize = jnp.dtype(out_dtype).itemsize

    # Hoisted query projection with both biases folded in: one small matmul
    # outside the per-step path.
    s2 = (hidden_states @ w2 + (b1 + b2)).astype(jnp.float32)     # (B, H)

    # Pad seq to a sublane multiple so in-kernel reshapes are layout no-ops.
    s_pad = max(8, ((S + 7) // 8) * 8)

    # Fold batch into the matmul M dimension: few, fat grid steps.  No forced
    # multi-step split for single-TC chips; keep a 2-way split (v7x dual-TC)
    # only when each half still carries >= 512 M-rows.
    cb = max(1, min(B, rows_per_step // s_pad))
    if B > 1 and cb >= B:
        half = -(-B // 2)
        if half * s_pad >= 512:
            cb = half
    # VMEM cap: values double-buffer + f32 intermediates + outputs per item.
    # TODO(synk): very long sequences would need seq-axis tiling of the score
    # matmuls; here the whole (padded) sequence of each item sits in one block.
    per_item_bytes = s_pad * (3 * F + 3 * H) * 4 + 3 * T * (F + s_pad) * 4
    cb = min(cb, max(1, (20 * 2 ** 20) // per_item_bytes))

    grid = -(-B // cb)
    if grid > 1:
        cb = ((cb + 7) // 8) * 8        # keep resident-s2 row slices 8-aligned
        grid = -(-B // cb)
    Bp = grid * cb
    m_rows = cb * s_pad

    # Only materialize a padded copy of `values` when padding is actually
    # needed (padding is an extra full HBM pass over the largest input).
    if Bp != B or s_pad != S:
        vals_in = jnp.pad(values, ((0, Bp - B), (0, s_pad - S), (0, 0)))
    else:
        vals_in = values
    s2_in = jnp.pad(s2, ((0, Bp - B), (0, 0))) if Bp != B else s2
    vals_flat = vals_in.reshape(Bp * s_pad, F)                # free reshape

    # Small resident weights as bf16 MXU operands (f32 accumulation in-kernel).
    # TODO(synk): upstream can pass `values` already in bf16 to halve the HBM
    # stream; the kernel accepts any float dtype and casts MXU operands itself.
    w1_bf = w1.astype(jnp.bfloat16)
    v_bf = v.astype(jnp.bfloat16)
    bv2 = bv.reshape(1, T).astype(jnp.float32)

    kernel = functools.partial(_bahdanau_kernel, cb=cb, s_pad=s_pad,
                               s_real=S, n_steps=grid)

    cost = pl.CostEstimate(
        flops=2 * Bp * s_pad * (F * H + H * T + T * F),
        transcendentals=Bp * s_pad * (H + T),
        bytes_accessed=(in_itemsize * Bp * s_pad * F
                        + 4 * Bp * H + 2 * (F * H + H * T) + 4 * T
                        + out_itemsize * (Bp * T * F + Bp * T * s_pad)),
    )

    # Explicit (conservative) VMEM budget so fat tiles still double-buffer on
    # v5e's 16 MiB default scoped limit and stay inside v7x's 64 MiB.
    vmem_need = (2 * m_rows * F * in_itemsize                 # values dbuf
                 + 2 * Bp * H * 4                             # resident s2
                 + 2 * (F * H + H * T) * 2 + 4 * T            # resident weights
                 + 2 * cb * T * (F + s_pad) * out_itemsize    # outputs dbuf
                 + m_rows * (2 * H * 4 + F * 2 + H * 2)       # s1/t + bf16 copies
                 + 4 * cb * T * (s_pad + F) * 4)              # score/attn/ctx
    vmem_limit = int(min(48 * 2 ** 20, max(32 * 2 ** 20, 2 * vmem_need)))

    grid_spec = pltpu.PrefetchScalarGridSpec(
        num_scalar_prefetch=0,
        grid=(grid,),
        in_specs=[
            pl.BlockSpec((m_rows, F), lambda i: (i, 0)),      # values (flattened)
            pl.BlockSpec((Bp, H), lambda i: (0, 0)),          # s2, fully resident
            pl.BlockSpec((F, H), lambda i: (0, 0)),           # W1 (resident bf16)
            pl.BlockSpec((H, T), lambda i: (0, 0)),           # V  (resident bf16)
            pl.BlockSpec((1, T), lambda i: (0, 0)),           # bV (resident)
        ],
        out_specs=[
            pl.BlockSpec((cb, T, F), lambda i: (i, 0, 0)),      # context
            pl.BlockSpec((cb, T, s_pad), lambda i: (i, 0, 0)),  # attn (T, S_pad)
        ],
    )

    ctx_p, attn_t = pl.pallas_call(
        kernel,
        out_shape=(
            jax.ShapeDtypeStruct((Bp, T, F), out_dtype),
            jax.ShapeDtypeStruct((Bp, T, s_pad), out_dtype),
        ),
        grid_spec=grid_spec,
        compiler_params=pltpu.CompilerParams(
            dimension_semantics=("parallel",),
            vmem_limit_bytes=vmem_limit),
        cost_estimate=cost,
    )(vals_flat, s2_in, w1_bf, v_bf, bv2)

    context = ctx_p if Bp == B else ctx_p[:B]                 # (B, T, F)
    attn = jnp.swapaxes(attn_t, 1, 2)                         # layout plumbing
    if Bp != B or s_pad != S:
        attn = attn[:B, :S, :]                                # (B, S, T)
    return context, attn
    # TODO(synk): if this ever becomes store-bound with F < 128, present ctx
    # as a lane-dense (Bp, T*F) slab and reshape in the wrapper; at these
    # sizes the context writeback is negligible so the (cb,T,F) block is kept.


def _reference(hidden_states, values, params):
    """Pure-JAX reference matching the PyTorch forward exactly."""
    w1, b1, w2, b2, v, bv = params
    hid = hidden_states[:, None, :]                           # (B, 1, F)
    s1 = values @ w1 + b1                                     # (B, S, H)
    s2 = hid @ w2 + b2                                        # (B, 1, H)
    score = jnp.tanh(s1 + s2) @ v + bv                        # (B, S, T)
    attn = jax.nn.softmax(score, axis=1)                      # (B, S, T)
    ctx = jnp.einsum("bst,bsf->btf", attn, values)            # (B, T, F)
    return ctx, attn


def _run_case(key, B, S, F, H, T, label):
    k = jax.random.split(key, 8)
    hidden_states = jax.random.normal(k[0], (B, F), dtype=jnp.float32)
    values = jax.random.normal(k[1], (B, S, F), dtype=jnp.float32)

    scale = 0.1
    w1 = scale * jax.random.normal(k[2], (F, H), dtype=jnp.float32)
    b1 = scale * jax.random.normal(k[3], (H,), dtype=jnp.float32)
    w2 = scale * jax.random.normal(k[4], (F, H), dtype=jnp.float32)
    b2 = scale * jax.random.normal(k[5], (H,), dtype=jnp.float32)
    v = scale * jax.random.normal(k[6], (H, T), dtype=jnp.float32)
    bv = scale * jax.random.normal(k[7], (T,), dtype=jnp.float32)
    params = (w1, b1, w2, b2, v, bv)

    ctx, attn = bahdanau_attention(hidden_states, values, params)
    jax.block_until_ready((ctx, attn))

    ctx_ref, attn_ref = _reference(hidden_states, values, params)
    assert ctx.shape == (B, T, F) and attn.shape == (B, S, T), label
    # Tolerance covers bf16 MXU operands (f32 accumulation, f32 tanh/softmax,
    # exact softmax normalization); semantic bugs would be O(0.1).
    assert jnp.allclose(ctx, ctx_ref, atol=5e-3, rtol=5e-3), label
    assert jnp.allclose(attn, attn_ref, atol=5e-3, rtol=5e-3), label


if __name__ == "__main__":
    key = jax.random.PRNGKey(0)
    k0, k1 = jax.random.split(key)
    # Primary small case (batch=2, seq=8, in_features=32, hidden=32, num_task=4).
    _run_case(k0, B=2, S=8, F=32, H=32, T=4, label="case0")
    # Exercises the seq padding/masking path and a larger batch fold.
    _run_case(k1, B=16, S=12, F=64, H=48, T=3, label="case1")
    print("KERNEL_OK")
</pallas_src>

<mosaic_0001>
module attributes {stable_mosaic.version = 11 : i64} {
  func.func @_bahdanau_kernel(%arg0: i32, %arg1: memref<16x32xf32, #tpu.memory_space<vmem>>, %arg2: memref<2x32xf32, #tpu.memory_space<vmem>>, %arg3: memref<32x32xbf16, #tpu.memory_space<vmem>>, %arg4: memref<32x4xbf16, #tpu.memory_space<vmem>>, %arg5: memref<1x4xf32, #tpu.memory_space<vmem>>, %arg6: memref<2x4x32xf32, #tpu.memory_space<vmem>>, %arg7: memref<2x4x8xf32, #tpu.memory_space<vmem>>) attributes {dimension_semantics = [#tpu.dimension_semantics<parallel>], iteration_bounds = array<i64: 1>, scalar_prefetch = 0 : i64, scratch_operands = 0 : i64, tpu.core_type = #tpu.core_type<tc>, window_params = [{transform_indices = @transform_0, window_bounds = array<i64: 16, 32>}, {pipeline_mode = #tpu.pipeline_mode<synchronous>, transform_indices = @transform_1, window_bounds = array<i64: 2, 32>}, {pipeline_mode = #tpu.pipeline_mode<synchronous>, transform_indices = @transform_2, window_bounds = array<i64: 32, 32>}, {pipeline_mode = #tpu.pipeline_mode<synchronous>, transform_indices = @transform_3, window_bounds = array<i64: 32, 4>}, {pipeline_mode = #tpu.pipeline_mode<synchronous>, transform_indices = @transform_4, window_bounds = array<i64: 1, 4>}, {transform_indices = @transform_5, window_bounds = array<i64: 2, 4, 32>}, {transform_indices = @transform_6, window_bounds = array<i64: 2, 4, 8>}]} {
    %c0 = arith.constant 0 : index
    %c0_0 = arith.constant 0 : index
    %0 = vector.load %arg1[%c0, %c0_0] : memref<16x32xf32, #tpu.memory_space<vmem>>, vector<16x32xf32>
    %1 = arith.truncf %0 : vector<16x32xf32> to vector<16x32xbf16>
    %c0_1 = arith.constant 0 : index
    %c0_2 = arith.constant 0 : index
    %2 = vector.load %arg3[%c0_1, %c0_2] : memref<32x32xbf16, #tpu.memory_space<vmem>>, vector<32x32xbf16>
    %cst = arith.constant dense<0.000000e+00> : vector<16x32xf32>
    %3 = tpu.matmul %1, %2, %cst {dimension_numbers = #tpu.dot_dimension_numbers<[1], [0], [0], [1], [0, 0, 1, 1], [], []>} : vector<16x32xbf16>, vector<32x32xbf16>, vector<16x32xf32> -> vector<16x32xf32>
    %c0_3 = arith.constant 0 : index
    %c0_4 = arith.constant 0 : index
    %4 = vector.load %arg2[%c0_3, %c0_4] : memref<2x32xf32, #tpu.memory_space<vmem>>, vector<2x32xf32>
    %5 = vector.shape_cast %3 : vector<16x32xf32> to vector<2x8x32xf32>
    %6 = vector.shape_cast %4 : vector<2x32xf32> to vector<2x1x32xf32>
    %7 = vector.broadcast %6 : vector<2x1x32xf32> to vector<2x8x32xf32>
    %8 = arith.addf %5, %7 : vector<2x8x32xf32>
    %9 = math.tanh %8 : vector<2x8x32xf32>
    %10 = vector.shape_cast %9 : vector<2x8x32xf32> to vector<16x32xf32>
    %11 = arith.truncf %10 : vector<16x32xf32> to vector<16x32xbf16>
    %c0_5 = arith.constant 0 : index
    %c0_6 = arith.constant 0 : index
    %12 = vector.load %arg4[%c0_5, %c0_6] : memref<32x4xbf16, #tpu.memory_space<vmem>>, vector<32x4xbf16>
    %cst_7 = arith.constant dense<0.000000e+00> : vector<16x4xf32>
    %13 = tpu.matmul %11, %12, %cst_7 {dimension_numbers = #tpu.dot_dimension_numbers<[1], [0], [0], [1], [0, 0, 1, 1], [], []>} : vector<16x32xbf16>, vector<32x4xbf16>, vector<16x4xf32> -> vector<16x4xf32>
    %c0_8 = arith.constant 0 : index
    %c0_9 = arith.constant 0 : index
    %14 = vector.load %arg5[%c0_8, %c0_9] : memref<1x4xf32, #tpu.memory_space<vmem>>, vector<1x4xf32>
    %15 = vector.broadcast %14 : vector<1x4xf32> to vector<16x4xf32>
    %16 = arith.addf %13, %15 : vector<16x4xf32>
    %17 = vector.shape_cast %16 : vector<16x4xf32> to vector<2x8x4xf32>
    %18 = tpu.transpose %17, [0, 2, 1] : vector<2x8x4xf32> -> vector<2x4x8xf32>
    %cst_10 = arith.constant dense<0xFF800000> : vector<2x4xf32>
    %19 = vector.multi_reduction <maximumf>, %18, %cst_10 [2] : vector<2x4x8xf32> to vector<2x4xf32>
    %20 = vector.shape_cast %19 : vector<2x4xf32> to vector<2x4x1xf32>
    %21 = vector.broadcast %20 : vector<2x4x1xf32> to vector<2x4x8xf32>
    %22 = arith.subf %18, %21 : vector<2x4x8xf32>
    %23 = math.exp %22 : vector<2x4x8xf32>
    %cst_11 = arith.constant dense<0.000000e+00> : vector<2x4xf32>
    %24 = vector.multi_reduction <add>, %23, %cst_11 [2] : vector<2x4x8xf32> to vector<2x4xf32>
    %25 = vector.shape_cast %24 : vector<2x4xf32> to vector<2x4x1xf32>
    %26 = vector.broadcast %25 : vector<2x4x1xf32> to vector<2x4x8xf32>
    %27 = arith.divf %23, %26 : vector<2x4x8xf32>
    %28 = arith.truncf %27 : vector<2x4x8xf32> to vector<2x4x8xbf16>
    %29 = vector.shape_cast %1 : vector<16x32xbf16> to vector<2x8x32xbf16>
    %cst_12 = arith.constant dense<0.000000e+00> : vector<2x4x32xf32>
    %30 = tpu.matmul %28, %29, %cst_12 {dimension_numbers = #tpu.dot_dimension_numbers<[2], [1], [1], [2], [0, 0, 0, 1, 1, 2], [0], [0]>} : vector<2x4x8xbf16>, vector<2x8x32xbf16>, vector<2x4x32xf32> -> vector<2x4x32xf32>
    %c0_13 = arith.constant 0 : index
    %c0_14 = arith.constant 0 : index
    %c0_15 = arith.constant 0 : index
    %31 = vector.load %arg6[%c0_13, %c0_14, %c0_15] : memref<2x4x32xf32, #tpu.memory_space<vmem>>, vector<2x4x32xf32>
    tpu.vector_store %arg6[%c0_13, %c0_14, %c0_15], %30 {strides = array<i32>} : memref<2x4x32xf32, #tpu.memory_space<vmem>>, vector<2x4x32xf32>,
    %c0_16 = arith.constant 0 : index
    %c0_17 = arith.constant 0 : index
    %c0_18 = arith.constant 0 : index
    %32 = vector.load %arg7[%c0_16, %c0_17, %c0_18] : memref<2x4x8xf32, #tpu.memory_space<vmem>>, vector<2x4x8xf32>
    tpu.vector_store %arg7[%c0_16, %c0_17, %c0_18], %27 {strides = array<i32>} : memref<2x4x8xf32, #tpu.memory_space<vmem>>, vector<2x4x8xf32>,
    return
  }
  func.func @transform_0(%arg0: i32) -> (i32, i32) {
    %c0_i32 = arith.constant 0 : i32
    %c0_i32_0 = arith.constant 0 : i32
    return %arg0, %c0_i32 : i32, i32
  }
  func.func @transform_1(%arg0: i32) -> (i32, i32) {
    %c0_i32 = arith.constant 0 : i32
    %c0_i32_0 = arith.constant 0 : i32
    %c0_i32_1 = arith.constant 0 : i32
    return %c0_i32, %c0_i32_0 : i32, i32
  }
  func.func @transform_2(%arg0: i32) -> (i32, i32) {
    %c0_i32 = arith.constant 0 : i32
    %c0_i32_0 = arith.constant 0 : i32
    %c0_i32_1 = arith.constant 0 : i32
    return %c0_i32, %c0_i32_0 : i32, i32
  }
  func.func @transform_3(%arg0: i32) -> (i32, i32) {
    %c0_i32 = arith.constant 0 : i32
    %c0_i32_0 = arith.constant 0 : i32
    %c0_i32_1 = arith.constant 0 : i32
    return %c0_i32, %c0_i32_0 : i32, i32
  }
  func.func @transform_4(%arg0: i32) -> (i32, i32) {
    %c0_i32 = arith.constant 0 : i32
    %c0_i32_0 = arith.constant 0 : i32
    %c0_i32_1 = arith.constant 0 : i32
    return %c0_i32, %c0_i32_0 : i32, i32
  }
  func.func @transform_5(%arg0: i32) -> (i32, i32, i32) {
    %c0_i32 = arith.constant 0 : i32
    %c0_i32_0 = arith.constant 0 : i32
    %c0_i32_1 = arith.constant 0 : i32
    return %arg0, %c0_i32, %c0_i32_0 : i32, i32, i32
  }
  func.func @transform_6(%arg0: i32) -> (i32, i32, i32) {
    %c0_i32 = arith.constant 0 : i32
    %c0_i32_0 = arith.constant 0 : i32
    %c0_i32_1 = arith.constant 0 : i32
    return %arg0, %c0_i32, %c0_i32_0 : i32, i32, i32
  }
}

</mosaic_0001>

<bundles_post_ra>
// kernel: tpu_custom_call.1
= control target key start
LH: loop header
LB: loop body
LE: loop exit
PB: predicated region body
PF: predicated region fallthrough
CT: control target
= control target key end

     0   :  { %12 = vsyncpa [#allocation3], 0  ;;  %s678_s0 = inlined_call_operand.vmem [shape: f32[16,32], index: 0, kind: input, shape index: {}]   ;;  %s679_s1 = inlined_call_operand.vmem [shape: f32[2,32], index: 1, kind: input, shape index: {}]   ;;  %s680_s2 = inlined_call_operand.hbm [shape: bf16[32,32], index: 2, kind: input, shape index: {}]   ;;  %s681_s3 = inlined_call_operand.vmem [shape: bf16[32,4], index: 3, kind: input, shape index: {}]   ;;  %s682_s4 = inlined_call_operand.vmem [shape: f32[1,4], index: 4, kind: input, shape index: {}]   ;;  %s683_s5 = inlined_call_operand.hbm [shape: f32[2,4,32], index: 5, kind: output, shape index: {0}]   ;;  %s684_s6 = inlined_call_operand.hbm [shape: f32[2,4,8], index: 6, kind: output, shape index: {1}]  }
   0x1   :  { %13 = vsyncpa [#allocation4], 0 }
   0x2   :  { %14 = vsyncpa [#allocation7], 0  ;;  %s577_s21 = smov [#allocation2]  }
   0x3   :  { %s24_s22 = sshll.u32 %s577_s21, 4  ;;  %s25_s22 = int_to_ptr.vmem [resolvable:$true] %s24_s22 }
   0x4   :  { %s519_s23 = scalar_lea.vmem %s25_s22, 256  ;;  %p524_p1 = scmp.lt.s32.totalorder %s25_s22, %s25_s22 }
   0x5   :  { %p520_p0 = scmp.ne.s32.totalorder %s25_s22, %s519_s23  ;;  %p525_p2 = scmp.lt.s32.totalorder %s519_s23, %s519_s23 }
   0x7   :  { %p526_p3 = por %p525_p2, %p524_p1 }
   0x9   :  { %p527_p4 = pnand %p526_p3, %p520_p0 }
   0xb   :  { %530 = shalt.err (!%p527_p4)
}
   0xc   :  { %s578_s24 = smov 64   ;;  %s579_s25 = smov 4  }
   0xd   :  { %30 = dma.hbm_to_vmem [thread:$0]  %s680_s2, 256, %s25_s22, [#allocation3], %s578_s24, %s578_s24, %s579_s25  }
   0xe   :  { %571 = dma.done.wait [#allocation3], 256  }
   0xf   :  { %572 = vsyncadd [#allocation3], 4294967040  ;;  %v580_v0 = vmov 0.0   ;;  %vm581_vm0 = vmmov 0   ;;  %v495_v1 = vld [vmem:[#allocation2 + $0x8] sm:$0xff]   ;;  %v496_v2 = vld [vmem:[#allocation2] sm:$0xff]   ;;  %v116_v10 = vlaneseq }
  0x10   :  { %459 = vmatprep.subr.bf16.mxu0 %v580_v0  ;;  %463 = vmatprep.mubr.msk.bf16.mxu0 %vm581_vm0, %v580_v0  ;;  %v631_v3 = vld [vmem:[%s678_s0] sm:$0xff]  ;;  %v636_v4 = vld [vmem:[%s678_s0 + $0x8] sm:$0xff]  ;;  %vm58_vm1 = vcmask 261120   ;;  %v582_v8 = vmov 1966171168   ;;  %vm273_vm2 = vcmask 60416  }
  0x11   :  { %467 = vmatprep.subr.bf16.mxu1 %v580_v0  ;;  %471 = vmatprep.mubr.msk.bf16.mxu1 %vm581_vm0, %v580_v0  ;;  %v41_v5 = vpack.c.bf16 %v636_v4, %v631_v3  ;;  %v497_v6 = vld [vmem:[%s681_s3 + $0x8] sm:$0xff]   ;;  %v498_v7 = vld [vmem:[%s681_s3] sm:$0xff]   ;;  %v114_v9 = vunpack.c.l.s4 %v582_v8  ;;  %v117_v12 = vshrl.u32 %v116_v10, 7  ;;  %v447_v51 = vpack.c.bf16 %v631_v3, %v631_v3 }
  0x12   :  { %460 = vmatpush3.bf16.msra.mxu0 %v495_v1  ;;  %468 = vmatpush3.bf16.msra.mxu1 %v497_v6  ;;  %v438_v14 = vld.sshfl [vmem:[%s679_s1] sm:$0x11 pattern:$0x75316420]  ;;  %vm307_vm3 = vcmask 1043456   ;;  %v448_v53 = vpack.c.bf16 %v636_v4, %v636_v4  ;;  %vm303_vm4 = vcmask 64512  }
  0x13   :  { %461 = vmatprep.subr.bf16.mxu0 %v580_v0  ;;  %469 = vmatprep.subr.bf16.mxu1 %v580_v0  ;;  %v115_v11 = vunpack.c.0.s8 %v114_v9  ;;  %v112_v15 = vcombine.high %v438_v14, %v438_v14  ;;  %v129_v17 = vsub.s32 0, %v117_v12  ;;  %v439_v30 = vld [vmem:[%s682_s4] ss:$0 sm:$0xff]  ;;  %v309_v52 = vsel %vm307_vm3, %v447_v51, 0  ;;  %s583_s4 = smov [#allocation6]  }
  0x14   :  { %v355_v54 = vsel %vm307_vm3, %v448_v53, 0  ;;  %s419_s12 = sshll.u32 %s583_s4, 4  ;;  %s420_s12 = int_to_ptr.vmem [resolvable:$true] %s419_s12 }
  0x15   :  { %v118_v13 = vsub.s32 %v115_v11, %v117_v12  ;;  %s531_s13 = scalar_lea.vmem %s420_s12, 128  ;;  %p536_p6 = scmp.lt.s32.totalorder %s420_s12, %s420_s12 }
  0x16   :  { %462 = vmatpush3.bf16.msra.mxu0 %v496_v2  ;;  %470 = vmatpush3.bf16.msra.mxu1 %v498_v7  ;;  %p532_p5 = scmp.ne.s32.totalorder %s420_s12, %s531_s13  ;;  %p537_p7 = scmp.lt.s32.totalorder %s531_s13, %s531_s13 }
  0x17   :  { %475 = vmatprep.subr.bf16.mxu0 %v580_v0  ;;  %481 = vmatprep.subr.bf16.mxu1 %v580_v0  ;;  %v119_v16 = vrot.slane %v438_v14, %v118_v13  ;;  %v126_v18 = vrot.slane %v112_v15, %v118_v13 }
  0x18   :  { %p538_p8 = por %p537_p7, %p536_p6 }
  0x19   :  { %464 = vmatmul.mubr.msk.bf16.vlgmr.msra.gmra.mxu0 %vm58_vm1, %v41_v5  ;;  %v130_v19 = vrot.slane %v119_v16, %v129_v17  ;;  %v134_v21 = vrot.slane %v126_v18, %v129_v17 }
  0x1a   :  { %477 = vmatprep.mubr.msk.bf16.mxu0 %vm581_vm0, %v580_v0  ;;  %476 = vmatpush3.bf16.msra.mxu0 %v309_v52  ;;  %p539_p9 = pnand %p538_p8, %p532_p5 }
  0xd9   :  { %v96_v20 = vpop.f32.mrf.mxu0 }
  0xda   :  { %v137_v22 = vadd.f32 %v130_v19, %v96_v20 }
  0xdb   :  { %v465_v23 = vpop.f32.mrf.mxu0 }
  0xdc   :  { %499 = vtanh.f32 %v137_v22 }
  0xdd   :  { %v99_v24 = vpop.f32.mrf.mxu0 }
  0xde   :  { %v138_v25 = vadd.f32 %v134_v21, %v99_v24 }
  0xdf   :  { %v466_v26 = vpop.f32.mrf.mxu0 }
  0xe0   :  { %501 = vtanh.f32 %v138_v25 }
  0xe9   :  { %v500_v27 = vpop.eup %499 }
  0xed   :  { %v502_v28 = vpop.eup %501 }
  0xee   :  { %v141_v29 = vpack.c.bf16 %v502_v28, %v500_v27 }
  0xf0   :  { %472 = vmatmul.mubr.msk.bf16.vlgmr.msra.gmra.mxu1 %vm58_vm1, %v141_v29 }
  0xf1   :  { %483 = vmatprep.mubr.msk.bf16.mxu1 %vm581_vm0, %v580_v0  ;;  %482 = vmatpush3.bf16.msra.mxu1 %v355_v54 }
 0x1b0   :  { %v202_v31 = vpop.f32.mrf.mxu1 }
 0x1b1   :  { %v203_v32 = vadd.f32 %v439_v30, %v202_v31 }
 0x1b2   :  { %v473_v33 = vpop.f32.mrf.mxu1 }
 0x1b3   :  { %209 = vxpose.xlu0.b32.start.end [1/1] (short) (narrow) %v203_v32, 8 }
 0x1b4   :  { %v205_v34 = vpop.f32.mrf.mxu1 }
 0x1b5   :  { %v206_v35 = vadd.f32 %v439_v30, %v205_v34 }
 0x1b6   :  { %v474_v36 = vpop.f32.mrf.mxu1 }
 0x1b7   :  { %241 = vxpose.xlu0.b32.start.end [1/1] (short) (narrow) %v206_v35, 8 }
 0x22f   :  { %v225_v37 = vpop.trf.xlu0 }
 0x230   :  { %v274_v38 = vsel %vm273_vm2, %v225_v37, -inf }
 0x231   :  { %275 = vmax.xlane.f32.xlu1 %v274_v38 }
 0x233   :  { %v257_v39 = vpop.trf.xlu0 }
 0x234   :  { %v277_v40 = vsel %vm273_vm2, %v257_v39, -inf }
 0x235   :  { %278 = vmax.xlane.f32.xlu1 %v277_v40 }
 0x2ba   :  { %v276_v41 = vpop.xlane.xlu1 %275 }
 0x2bb   :  { %v280_v42 = vsub.f32 %v225_v37, %v276_v41 }
 0x2bd   :  { %v282_v43 = vmul.f32 1.442695, %v280_v42 }
 0x2be   :  { %v279_v44 = vpop.xlane.xlu1 %278 }
 0x2bf   :  { %503 = vpow2.f32 %v282_v43  ;;  %v281_v45 = vsub.f32 %v257_v39, %v279_v44 }
 0x2c1   :  { %v284_v46 = vmul.f32 1.442695, %v281_v45 }
 0x2c3   :  { %505 = vpow2.f32 %v284_v46 }
 0x2cc   :  { %v504_v47 = vpop.eup %503 }
 0x2cd   :  { %v286_v48 = vsel %vm273_vm2, %v504_v47, 0.0 }
 0x2ce   :  { %287 = vadd.xlane.f32.xlu0 %v286_v48 }
 0x2d0   :  { %v506_v49 = vpop.eup %505 }
 0x2d1   :  { %v289_v50 = vsel %vm273_vm2, %v506_v49, 0.0 }
 0x2d2   :  { %290 = vadd.xlane.f32.xlu1 %v289_v50 }
 0x357   :  { %v288_v55 = vpop.xlane.xlu0 %287 }
 0x358   :  { %507 = vrcp.f32 %v288_v55 }
 0x35b   :  { %v291_v56 = vpop.xlane.xlu1 %290 }
 0x35c   :  { %509 = vrcp.f32 %v291_v56 }
 0x365   :  { %v508_v57 = vpop.eup %507 }
 0x366   :  { %v293_v58 = vmul.f32 %v508_v57, %v504_v47 }
 0x368   :  { %400 = vst.msk [vmem:[#allocation6] sm:$0xf] %vm273_vm2, %v293_v58  ;;  %v296_v59 = vpack.c.bf16 %v293_v58, %v293_v58 }
 0x369   :  { %v510_v60 = vpop.eup %509 }
 0x36a   :  { %v295_v61 = vmul.f32 %v510_v60, %v506_v49  ;;  %478 = vmatmul.mubr.msk.bf16.vlgmr.msra.gmra.mxu0 %vm303_vm4, %v296_v59 }
 0x36c   :  { %401 = vst.msk [vmem:[#allocation6 + $0x4] sm:$0xf] %vm273_vm2, %v295_v61  ;;  %v297_v62 = vpack.c.bf16 %v295_v61, %v295_v61 }
 0x36e   :  { %484 = vmatmul.mubr.msk.bf16.vlgmr.msra.gmra.mxu1 %vm303_vm4, %v297_v62 }
 0x36f   :  { %542 = shalt.err (!%p539_p9)
}
 0x370   :  { %425 = dma.vmem_to_hbm [thread:$0]  %s420_s12, 128, %s684_s6, [#allocation7], %s578_s24, %s578_s24, %s579_s25   ;;  %vm397_vm5 = vcmask 257024  }
 0x371   :  { %s584_s16 = smov [#allocation5]  }
 0x372   :  { %s407_s17 = sshll.u32 %s584_s16, 4  ;;  %s408_s17 = int_to_ptr.vmem [resolvable:$true] %s407_s17 }
 0x373   :  { %s551_s18 = scalar_lea.vmem %s408_s17, 128  ;;  %p556_p11 = scmp.lt.s32.totalorder %s408_s17, %s408_s17 }
 0x374   :  { %p552_p10 = scmp.ne.s32.totalorder %s408_s17, %s551_s18  ;;  %p557_p12 = scmp.lt.s32.totalorder %s551_s18, %s551_s18 }
 0x376   :  { %p558_p13 = por %p557_p12, %p556_p11 }
 0x378   :  { %p559_p0 = pnand %p558_p13, %p552_p10 }
 0x42a   :  { %v345_v63 = vpop.f32.mrf.mxu0 }
 0x42b   :  { %398 = vst.msk [vmem:[#allocation5] sm:$0xf] %vm397_vm5, %v345_v63 }
 0x42c   :  { %v479_v0 = vpop.f32.mrf.mxu0 }
 0x42e   :  { %v348_v1 = vpop.f32.mrf.mxu0  ;;  %v391_v2 = vpop.f32.mrf.mxu1 }
 0x42f   :  { %399 = vst.msk [vmem:[#allocation5 + $0x4] sm:$0xf] %vm397_vm5, %v391_v2 }
 0x430   :  { %v480_v3 = vpop.f32.mrf.mxu0  ;;  %v485_v4 = vpop.f32.mrf.mxu1 }
 0x431   :  { %562 = shalt.err (!%p559_p0)
}
 0x432   :  { %413 = dma.vmem_to_hbm [thread:$0]  %s408_s17, 128, %s683_s5, [#allocation4], %s578_s24, %s578_s24, %s579_s25   ;;  %v394_v5 = vpop.f32.mrf.mxu1 }
 0x434   :  { %v486_v6 = vpop.f32.mrf.mxu1 }
 0x435   :  { %573 = dma.done.wait [#allocation4], 128  }
 0x436   :  { %574 = vsyncadd [#allocation4], 4294967168 }
 0x437   :  { %575 = dma.done.wait [#allocation7], 128  }
 0x438   :  { %576 = vsyncadd [#allocation7], 4294967168 }
 0x439   :  { %432 = vsyncpa [#allocation3], 1 }
 0x43a   :  { %433 = vsyncpa [#allocation4], 1 }
 0x43b   :  { %434 = vsyncpa [#allocation7], 1 }

</bundles_post_ra>
